<compile_context>
chip_gen: v7x
topology: tpu7x:2x2x1
jax: 0.10.0
libtpu: 0.0.40
codegen_flags: <defaults>
</compile_context>

<pallas_src>
import functools

import jax
import jax.numpy as jnp
from jax import lax
from jax.experimental import pallas as pl
from jax.experimental.pallas import tpu as pltpu

_LANE = 128


def _round_up(x, m):
    return ((x + m - 1) // m) * m


# ---------------------------------------------------------------------------
# Pallas kernel: fused (patches @ W) + bias (+ ReLU), lane-dense 128-wide out
# ---------------------------------------------------------------------------
def _conv_mm_kernel(a_ref, w_ref, b_ref, o_ref, *, apply_relu):
    # a_ref: (tm, K_pad)     bf16 im2col rows (K zero-padded to a 128 multiple)
    # w_ref: (K_pad, O_pad)  bf16 conv weights, (kh, kw, c) row order
    # b_ref: (1, O_pad)      f32 bias (zero-padded)
    # o_ref: (tm, O_pad)     f32 output block (full 128-lane stores)
    acc = jnp.dot(a_ref[...], w_ref[...], preferred_element_type=jnp.float32)
    acc = acc + b_ref[...]
    if apply_relu:
        acc = jnp.maximum(acc, 0.0)
    o_ref[...] = acc.astype(o_ref.dtype)


def _fused_matmul_bias_relu(patches, w_mat, bias, apply_relu, tm_max=512):
    """patches: (M, K_pad) bf16, w_mat: (K_pad, O_pad) bf16, bias: (1, O_pad) f32.

    Returns (M, O_pad) float32.
    """
    M, K_pad = patches.shape
    O_pad = w_mat.shape[1]

    if M <= tm_max:
        # Whole problem in one grid step: no per-step overhead, weights +
        # activations trivially resident in VMEM; full-array-dim block is
        # always legal so no M padding is needed.
        tm, grid_m = M, 1
    else:
        # Tile M with (8,128)-aligned blocks; a partial last block is handled
        # by Pallas masking (no HBM pad pass over `patches`).
        tm, grid_m = tm_max, pl.cdiv(M, tm_max)

    kernel = functools.partial(_conv_mm_kernel, apply_relu=apply_relu)

    return pl.pallas_call(
        kernel,
        out_shape=jax.ShapeDtypeStruct((M, O_pad), jnp.float32),
        grid=(grid_m,),
        in_specs=[
            pl.BlockSpec((tm, K_pad), lambda i: (i, 0)),
            pl.BlockSpec((K_pad, O_pad), lambda i: (0, 0)),
            pl.BlockSpec((1, O_pad), lambda i: (0, 0)),
        ],
        out_specs=pl.BlockSpec((tm, O_pad), lambda i: (i, 0)),
        compiler_params=pltpu.CompilerParams(
            dimension_semantics=("parallel",),
            # Per-step footprint is <1 MiB; explicit cap keeps us well inside
            # every generation's budget (incl. v7x's 64 MiB per TensorCore).
            vmem_limit_bytes=32 * 1024 * 1024,
        ),
    )(patches, w_mat, bias)


# ---------------------------------------------------------------------------
# im2col (runs inside the jitted forward; XLA fuses the slices + concat)
# ---------------------------------------------------------------------------
def _im2col(x_nhwc, kernel_size, stride, padding, dilation, k_pad):
    N, H, W, C = x_nhwc.shape
    k, s, p, d = kernel_size, stride, padding, dilation
    if p:
        x_nhwc = jnp.pad(x_nhwc, ((0, 0), (p, p), (p, p), (0, 0)))
    Hp, Wp = H + 2 * p, W + 2 * p
    eff_k = d * (k - 1) + 1
    OH = (Hp - eff_k) // s + 1
    OW = (Wp - eff_k) // s + 1

    cols = []
    for kh in range(k):
        for kw in range(k):
            h0, w0 = kh * d, kw * d
            cols.append(x_nhwc[:, h0:h0 + s * OH:s, w0:w0 + s * OW:s, :])
    K = C * k * k
    if k_pad > K:
        # Fold contraction-dim zero padding into the same concat so the patch
        # matrix is written once, already lane-aligned.
        cols.append(jnp.zeros((N, OH, OW, k_pad - K), x_nhwc.dtype))
    patches = jnp.concatenate(cols, axis=-1)          # (N, OH, OW, K_pad)
    return patches.reshape(N * OH * OW, k_pad), (N, OH, OW)


@functools.partial(
    jax.jit,
    static_argnames=("kernel_size", "stride", "padding", "dilation",
                     "out_channels", "k_pad", "apply_relu"))
def _conv2d_forward(x, w_packed, b_packed, *, kernel_size, stride, padding,
                    dilation, out_channels, k_pad, apply_relu):
    # x: (N, C, H, W) float32 (PyTorch layout).
    # TODO(synk): for large H/W, fuse the k*k patch extraction into the kernel
    # (block over output rows, build shifted slices in VMEM) to avoid the
    # ~k*k-times replicated im2col traffic in HBM.
    x_nhwc = jnp.transpose(x, (0, 2, 3, 1)).astype(jnp.bfloat16)
    patches, (N, OH, OW) = _im2col(x_nhwc, kernel_size, stride, padding,
                                   dilation, k_pad)
    out = _fused_matmul_bias_relu(patches, w_packed, b_packed, apply_relu)
    out = out[:, :out_channels].reshape(N, OH, OW, out_channels)
    return jnp.transpose(out, (0, 3, 1, 2))  # back to NCHW


# ---------------------------------------------------------------------------
# Conv2d module (conv + optional BN + optional ReLU)
# ---------------------------------------------------------------------------
class Conv2dPallas:

    def __init__(self, in_channels, out_channels, kernel_size, stride=1,
                 relu=True, padding=0, dilation=1, bn=False, key=None):
        # NOTE: the reference module's default dilation=0 is invalid for
        # torch.nn.Conv2d (raises at runtime); use the only valid
        # interpretation, dilation=1.
        if dilation == 0:
            dilation = 1
        self.in_channels = in_channels
        self.out_channels = out_channels
        self.kernel_size = kernel_size
        self.stride = stride
        self.padding = padding
        self.dilation = dilation
        self.relu = relu
        # TODO(synk): bn=True (training-mode BatchNorm2d with batch statistics)
        # not implemented; default config uses bn=False.
        self.bn = bn

        if key is None:
            key = jax.random.PRNGKey(0)
        kw_key, kb_key = jax.random.split(key)
        fan_in = in_channels * kernel_size * kernel_size
        bound = 1.0 / (fan_in ** 0.5)
        # Deterministic init mirroring PyTorch's uniform(-1/sqrt(fan_in), ...).
        self.weight = jax.random.uniform(
            kw_key, (out_channels, in_channels, kernel_size, kernel_size),
            dtype=jnp.float32, minval=-bound, maxval=bound)
        self.bias = jax.random.uniform(
            kb_key, (out_channels,), dtype=jnp.float32,
            minval=-bound, maxval=bound)

        # ---- one-time kernel-friendly parameter packing -------------------
        k = kernel_size
        K = in_channels * k * k
        self.K_pad = _round_up(max(K, _LANE), _LANE)
        self.O_pad = _round_up(max(out_channels, _LANE), _LANE)
        # (O, C, KH, KW) -> (KH, KW, C, O) -> (K, O): row order (kh, kw, c)
        # matches the NHWC im2col concat order above.
        w_kkc = jnp.transpose(self.weight, (2, 3, 1, 0)).reshape(
            K, out_channels)
        self.w_packed = (
            jnp.zeros((self.K_pad, self.O_pad), jnp.bfloat16)
            .at[:K, :out_channels].set(w_kkc.astype(jnp.bfloat16)))
        self.b_packed = (
            jnp.zeros((1, self.O_pad), jnp.float32)
            .at[0, :out_channels].set(self.bias))

    def __call__(self, x):
        return _conv2d_forward(
            x, self.w_packed, self.b_packed,
            kernel_size=self.kernel_size, stride=self.stride,
            padding=self.padding, dilation=self.dilation,
            out_channels=self.out_channels, k_pad=self.K_pad,
            apply_relu=self.relu)


# ---------------------------------------------------------------------------
def _reference(x, weight, bias, relu):
    ref = lax.conv_general_dilated(
        x, weight, window_strides=(1, 1), padding="VALID",
        dimension_numbers=("NCHW", "OIHW", "NCHW"))
    ref = ref + bias.reshape(1, -1, 1, 1)
    if relu:
        ref = jnp.maximum(ref, 0.0)
    return ref


if __name__ == "__main__":
    key = jax.random.PRNGKey(0)
    x_key, x2_key, p_key = jax.random.split(key, 3)

    N, C_in, C_out, ksize = 2, 4, 8, 3
    conv = Conv2dPallas(C_in, C_out, ksize, stride=1, relu=True,
                        padding=0, dilation=1, bn=False, key=p_key)

    # ---- small config (single-grid-step path) ------------------------------
    H = W = 16
    x = jax.random.normal(x_key, (N, C_in, H, W), dtype=jnp.float32)
    y = jax.block_until_ready(conv(x))
    assert y.shape == (N, C_out, H - ksize + 1, W - ksize + 1), y.shape
    ref = _reference(x, conv.weight, conv.bias, relu=True)
    max_err = float(jnp.max(jnp.abs(y - ref)))
    assert max_err < 5e-2, max_err

    # ---- larger spatial config (exercises the tiled, grid>1 path) ----------
    H2 = W2 = 34  # M = 2*32*32 = 2048 -> four 512-row "parallel" tiles
    x2 = jax.random.normal(x2_key, (N, C_in, H2, W2), dtype=jnp.float32)
    y2 = jax.block_until_ready(conv(x2))
    assert y2.shape == (N, C_out, H2 - ksize + 1, W2 - ksize + 1), y2.shape
    ref2 = _reference(x2, conv.weight, conv.bias, relu=True)
    max_err2 = float(jnp.max(jnp.abs(y2 - ref2)))
    assert max_err2 < 5e-2, max_err2

    print("KERNEL_OK")
</pallas_src>

<mosaic_0001>
module attributes {stable_mosaic.version = 11 : i64} {
  func.func @_conv_mm_kernel(%arg0: i32, %arg1: memref<392x128xbf16, #tpu.memory_space<vmem>>, %arg2: memref<128x128xbf16, #tpu.memory_space<vmem>>, %arg3: memref<1x128xf32, #tpu.memory_space<vmem>>, %arg4: memref<392x128xf32, #tpu.memory_space<vmem>>) attributes {dimension_semantics = [#tpu.dimension_semantics<parallel>], iteration_bounds = array<i64: 1>, scalar_prefetch = 0 : i64, scratch_operands = 0 : i64, tpu.core_type = #tpu.core_type<tc>, window_params = [{transform_indices = @transform_0, window_bounds = array<i64: 392, 128>}, {pipeline_mode = #tpu.pipeline_mode<synchronous>, transform_indices = @transform_1, window_bounds = array<i64: 128, 128>}, {pipeline_mode = #tpu.pipeline_mode<synchronous>, transform_indices = @transform_2, window_bounds = array<i64: 1, 128>}, {transform_indices = @transform_3, window_bounds = array<i64: 392, 128>}]} {
    %c0 = arith.constant 0 : index
    %c0_0 = arith.constant 0 : index
    %0 = vector.load %arg1[%c0, %c0_0] : memref<392x128xbf16, #tpu.memory_space<vmem>>, vector<392x128xbf16>
    %c0_1 = arith.constant 0 : index
    %c0_2 = arith.constant 0 : index
    %1 = vector.load %arg2[%c0_1, %c0_2] : memref<128x128xbf16, #tpu.memory_space<vmem>>, vector<128x128xbf16>
    %cst = arith.constant dense<0.000000e+00> : vector<392x128xf32>
    %2 = tpu.matmul %0, %1, %cst {dimension_numbers = #tpu.dot_dimension_numbers<[1], [0], [0], [1], [0, 0, 1, 1], [], []>} : vector<392x128xbf16>, vector<128x128xbf16>, vector<392x128xf32> -> vector<392x128xf32>
    %c0_3 = arith.constant 0 : index
    %c0_4 = arith.constant 0 : index
    %3 = vector.load %arg3[%c0_3, %c0_4] : memref<1x128xf32, #tpu.memory_space<vmem>>, vector<1x128xf32>
    %4 = vector.broadcast %3 : vector<1x128xf32> to vector<392x128xf32>
    %5 = arith.addf %2, %4 : vector<392x128xf32>
    %cst_5 = arith.constant 0.000000e+00 : f32
    %6 = vector.broadcast %cst_5 : f32 to vector<392x128xf32>
    %7 = arith.maximumf %5, %6 : vector<392x128xf32>
    %c0_6 = arith.constant 0 : index
    %c0_7 = arith.constant 0 : index
    %8 = vector.load %arg4[%c0_6, %c0_7] : memref<392x128xf32, #tpu.memory_space<vmem>>, vector<392x128xf32>
    tpu.vector_store %arg4[%c0_6, %c0_7], %7 {strides = array<i32>} : memref<392x128xf32, #tpu.memory_space<vmem>>, vector<392x128xf32>,
    return
  }
  func.func @transform_0(%arg0: i32) -> (i32, i32) {
    %c0_i32 = arith.constant 0 : i32
    %c0_i32_0 = arith.constant 0 : i32
    return %arg0, %c0_i32 : i32, i32
  }
  func.func @transform_1(%arg0: i32) -> (i32, i32) {
    %c0_i32 = arith.constant 0 : i32
    %c0_i32_0 = arith.constant 0 : i32
    %c0_i32_1 = arith.constant 0 : i32
    return %c0_i32, %c0_i32_0 : i32, i32
  }
  func.func @transform_2(%arg0: i32) -> (i32, i32) {
    %c0_i32 = arith.constant 0 : i32
    %c0_i32_0 = arith.constant 0 : i32
    %c0_i32_1 = arith.constant 0 : i32
    return %c0_i32, %c0_i32_0 : i32, i32
  }
  func.func @transform_3(%arg0: i32) -> (i32, i32) {
    %c0_i32 = arith.constant 0 : i32
    %c0_i32_0 = arith.constant 0 : i32
    return %arg0, %c0_i32 : i32, i32
  }
}

</mosaic_0001>

<bundles_post_ra>
// kernel: _conv2d_forward.1
= control target key start
LH: loop header
LB: loop body
LE: loop exit
PB: predicated region body
PF: predicated region fallthrough
CT: control target
= control target key end

     0   :  { %v851_v0 = vmov 0.0   ;;  %vm852_vm0 = vmmov 0   ;;  %s1239_s1 = inlined_call_operand.vmem [shape: bf16[128,128], index: 1, kind: input, shape index: {}]   ;;  %s1240_s0 = inlined_call_operand.vmem [shape: bf16[392,128], index: 0, kind: input, shape index: {}]   ;;  %s1241_s2 = inlined_call_operand.vmem [shape: f32[1,128], index: 2, kind: input, shape index: {}]   ;;  %s1242_s3 = inlined_call_operand.vmem [shape: f32[392,128], index: 3, kind: output, shape index: {}]  }
   0x1   :  { %684 = vmatprep.subr.bf16.mxu0 %v851_v0  ;;  %v818_v1 = vld [vmem:[%s1239_s1] sm:$0xff]   ;;  %800 = vmatprep.subr.bf16.mxu1 %v851_v0  ;;  %v819_v2 = vld [vmem:[%s1239_s1 + $0x8] sm:$0xff]   ;;  %v820_v3 = vld [vmem:[%s1239_s1 + $0x10] sm:$0xff]  }
   0x2   :  { %700 = vmatprep.mubr.msk.bf16.mxu0 %vm852_vm0, %v851_v0  ;;  %752 = vmatprep.mubr.msk.bf16.mxu1 %vm852_vm0, %v851_v0  ;;  %v821_v4 = vld [vmem:[%s1239_s1 + $0x18] sm:$0xff]   ;;  %v822_v5 = vld [vmem:[%s1239_s1 + $0x20] sm:$0xff]   ;;  %v823_v6 = vld [vmem:[%s1239_s1 + $0x28] sm:$0xff]  }
   0x3   :  { %685 = vmatpush3.bf16.msra.mxu0 %v818_v1  ;;  %808 = vmatpush3.bf16.msra.mxu1 %v818_v1  ;;  %v824_v7 = vld [vmem:[%s1239_s1 + $0x30] sm:$0xff]   ;;  %v825_v8 = vld [vmem:[%s1239_s1 + $0x38] sm:$0xff]   ;;  %v826_v9 = vld [vmem:[%s1240_s0] sm:$0xff]  }
   0x4   :  { %686 = vmatprep.subr.bf16.mxu0 %v851_v0  ;;  %801 = vmatprep.subr.bf16.mxu1 %v851_v0  ;;  %v827_v10 = vld [vmem:[%s1240_s0 + $0x68] sm:$0xff]   ;;  %v829_v12 = vld [vmem:[%s1240_s0 + $0x70] sm:$0xff]   ;;  %v831_v14 = vld [vmem:[%s1240_s0 + $0x78] sm:$0xff]  }
   0x5   :  { %v828_v11 = vld [vmem:[%s1240_s0 + $0x8] sm:$0xff]   ;;  %v830_v13 = vld [vmem:[%s1240_s0 + $0x10] sm:$0xff]   ;;  %v832_v15 = vld [vmem:[%s1240_s0 + $0x18] sm:$0xff]  }
   0x6   :  { %v833_v16 = vld [vmem:[%s1240_s0 + $0x80] sm:$0xff]   ;;  %v835_v18 = vld [vmem:[%s1240_s0 + $0x88] sm:$0xff]   ;;  %v837_v20 = vld [vmem:[%s1240_s0 + $0x90] sm:$0xff]  }
   0x7   :  { %687 = vmatpush3.bf16.msra.mxu0 %v819_v2  ;;  %809 = vmatpush3.bf16.msra.mxu1 %v819_v2  ;;  %v834_v17 = vld [vmem:[%s1240_s0 + $0x20] sm:$0xff]   ;;  %v836_v19 = vld [vmem:[%s1240_s0 + $0x28] sm:$0xff]   ;;  %v838_v21 = vld [vmem:[%s1240_s0 + $0x30] sm:$0xff]  }
   0x8   :  { %688 = vmatprep.subr.bf16.mxu0 %v851_v0  ;;  %802 = vmatprep.subr.bf16.mxu1 %v851_v0  ;;  %v839_v22 = vld [vmem:[%s1240_s0 + $0x98] sm:$0xff]   ;;  %v841_v24 = vld [vmem:[%s1240_s0 + $0xa0] sm:$0xff]   ;;  %v843_v26 = vld [vmem:[%s1240_s0 + $0xa8] sm:$0xff]  }
   0x9   :  { %v840_v23 = vld [vmem:[%s1240_s0 + $0x38] sm:$0xff]   ;;  %v842_v25 = vld [vmem:[%s1240_s0 + $0x40] sm:$0xff]   ;;  %v844_v27 = vld [vmem:[%s1240_s0 + $0x48] sm:$0xff]  }
   0xa   :  { %v845_v28 = vld [vmem:[%s1240_s0 + $0xb0] sm:$0xff]   ;;  %v847_v30 = vld [vmem:[%s1240_s0 + $0xb8] sm:$0xff]   ;;  %v849_v32 = vld [vmem:[%s1240_s0 + $0xc0] ss:$0 sps:$4 sm:$0xff]  }
   0xb   :  { %689 = vmatpush3.bf16.msra.mxu0 %v820_v3  ;;  %810 = vmatpush3.bf16.msra.mxu1 %v820_v3  ;;  %v846_v29 = vld [vmem:[%s1240_s0 + $0x50] sm:$0xff]   ;;  %v848_v31 = vld [vmem:[%s1240_s0 + $0x58] sm:$0xff]   ;;  %v850_v33 = vld [vmem:[%s1240_s0 + $0x60] sm:$0xff]  }
   0xc   :  { %690 = vmatprep.subr.bf16.mxu0 %v851_v0  ;;  %803 = vmatprep.subr.bf16.mxu1 %v851_v0  ;;  %v1041_v34 = vld [vmem:[%s1241_s2] ss:$0 sm:$0xff] }
   0xf   :  { %691 = vmatpush3.bf16.msra.mxu0 %v821_v4  ;;  %811 = vmatpush3.bf16.msra.mxu1 %v821_v4 }
  0x10   :  { %692 = vmatprep.subr.bf16.mxu0 %v851_v0  ;;  %804 = vmatprep.subr.bf16.mxu1 %v851_v0 }
  0x13   :  { %693 = vmatpush3.bf16.msra.mxu0 %v822_v5  ;;  %812 = vmatpush3.bf16.msra.mxu1 %v822_v5 }
  0x14   :  { %694 = vmatprep.subr.bf16.mxu0 %v851_v0  ;;  %805 = vmatprep.subr.bf16.mxu1 %v851_v0 }
  0x17   :  { %695 = vmatpush3.bf16.msra.mxu0 %v823_v6  ;;  %813 = vmatpush3.bf16.msra.mxu1 %v823_v6 }
  0x18   :  { %696 = vmatprep.subr.bf16.mxu0 %v851_v0  ;;  %806 = vmatprep.subr.bf16.mxu1 %v851_v0 }
  0x1b   :  { %697 = vmatpush3.bf16.msra.mxu0 %v824_v7  ;;  %814 = vmatpush3.bf16.msra.mxu1 %v824_v7 }
  0x1c   :  { %698 = vmatprep.subr.bf16.mxu0 %v851_v0  ;;  %807 = vmatprep.subr.bf16.mxu1 %v851_v0 }
  0x1f   :  { %699 = vmatpush3.bf16.msra.mxu0 %v825_v8  ;;  %815 = vmatpush3.bf16.msra.mxu1 %v825_v8 }
  0x22   :  { %701 = vmatmul.mubr.bf16.vlgmr.msra.gmra.mrb[0].mxu0 %v826_v9  ;;  %753 = vmatmul.mubr.bf16.vlgmr.msra.gmra.mrb[0].mxu1 %v827_v10 }
  0x23   :  { %704 = vmatprep.mubr.msk.bf16.mxu0 %vm852_vm0, %v851_v0  ;;  %756 = vmatprep.mubr.msk.bf16.mxu1 %vm852_vm0, %v851_v0 }
  0x2a   :  { %705 = vmatmul.mubr.bf16.gmra.mrb[4].mxu0 %v828_v11  ;;  %757 = vmatmul.mubr.bf16.gmra.mrb[4].mxu1 %v829_v12 }
  0x2b   :  { %708 = vmatprep.mubr.msk.bf16.mxu0 %vm852_vm0, %v851_v0  ;;  %760 = vmatprep.mubr.msk.bf16.mxu1 %vm852_vm0, %v851_v0 }
  0x32   :  { %709 = vmatmul.mubr.bf16.gmra.mrb[8].mxu0 %v830_v13  ;;  %761 = vmatmul.mubr.bf16.gmra.mrb[8].mxu1 %v831_v14 }
  0x33   :  { %712 = vmatprep.mubr.msk.bf16.mxu0 %vm852_vm0, %v851_v0  ;;  %764 = vmatprep.mubr.msk.bf16.mxu1 %vm852_vm0, %v851_v0 }
  0x3a   :  { %713 = vmatmul.mubr.bf16.gmra.mrb[12].mxu0 %v832_v15  ;;  %765 = vmatmul.mubr.bf16.gmra.mrb[12].mxu1 %v833_v16 }
  0x3b   :  { %716 = vmatprep.mubr.msk.bf16.mxu0 %vm852_vm0, %v851_v0  ;;  %768 = vmatprep.mubr.msk.bf16.mxu1 %vm852_vm0, %v851_v0 }
  0x42   :  { %717 = vmatmul.mubr.bf16.gmra.mrb[16].mxu0 %v834_v17  ;;  %769 = vmatmul.mubr.bf16.gmra.mrb[16].mxu1 %v835_v18 }
  0x43   :  { %720 = vmatprep.mubr.msk.bf16.mxu0 %vm852_vm0, %v851_v0  ;;  %772 = vmatprep.mubr.msk.bf16.mxu1 %vm852_vm0, %v851_v0 }
  0x4a   :  { %721 = vmatmul.mubr.bf16.gmra.mrb[20].mxu0 %v836_v19  ;;  %773 = vmatmul.mubr.bf16.gmra.mrb[20].mxu1 %v837_v20 }
  0x4b   :  { %724 = vmatprep.mubr.msk.bf16.mxu0 %vm852_vm0, %v851_v0  ;;  %776 = vmatprep.mubr.msk.bf16.mxu1 %vm852_vm0, %v851_v0 }
  0x52   :  { %725 = vmatmul.mubr.bf16.gmra.mrb[24].mxu0 %v838_v21  ;;  %777 = vmatmul.mubr.bf16.gmra.mrb[24].mxu1 %v839_v22 }
  0x53   :  { %728 = vmatprep.mubr.msk.bf16.mxu0 %vm852_vm0, %v851_v0  ;;  %780 = vmatprep.mubr.msk.bf16.mxu1 %vm852_vm0, %v851_v0 }
  0x5a   :  { %729 = vmatmul.mubr.bf16.gmra.mrb[28].mxu0 %v840_v23  ;;  %781 = vmatmul.mubr.bf16.gmra.mrb[28].mxu1 %v841_v24 }
  0x5b   :  { %732 = vmatprep.mubr.msk.bf16.mxu0 %vm852_vm0, %v851_v0  ;;  %784 = vmatprep.mubr.msk.bf16.mxu1 %vm852_vm0, %v851_v0 }
  0x62   :  { %733 = vmatmul.mubr.bf16.gmra.mrb[32].mxu0 %v842_v25  ;;  %785 = vmatmul.mubr.bf16.gmra.mrb[32].mxu1 %v843_v26 }
  0x63   :  { %736 = vmatprep.mubr.msk.bf16.mxu0 %vm852_vm0, %v851_v0  ;;  %788 = vmatprep.mubr.msk.bf16.mxu1 %vm852_vm0, %v851_v0 }
  0x6a   :  { %737 = vmatmul.mubr.bf16.gmra.mrb[36].mxu0 %v844_v27  ;;  %789 = vmatmul.mubr.bf16.gmra.mrb[36].mxu1 %v845_v28 }
  0x6b   :  { %740 = vmatprep.mubr.msk.bf16.mxu0 %vm852_vm0, %v851_v0  ;;  %792 = vmatprep.mubr.msk.bf16.mxu1 %vm852_vm0, %v851_v0 }
  0x72   :  { %741 = vmatmul.mubr.bf16.gmra.mrb[40].mxu0 %v846_v29  ;;  %793 = vmatmul.mubr.bf16.gmra.mrb[40].mxu1 %v847_v30 }
  0x73   :  { %744 = vmatprep.mubr.msk.bf16.mxu0 %vm852_vm0, %v851_v0  ;;  %796 = vmatprep.mubr.msk.bf16.mxu1 %vm852_vm0, %v851_v0 }
  0x7a   :  { %745 = vmatmul.mubr.bf16.gmra.mrb[44].mxu0 %v848_v31  ;;  %797 = vmatmul.mubr.bf16.gmra.mrb[44].mxu1 %v849_v32 }
  0x7b   :  { %748 = vmatprep.mubr.msk.bf16.mxu0 %vm852_vm0, %v851_v0 }
  0x82   :  { %749 = vmatmul.mubr.bf16.gmra.mrb[48].mxu0 %v850_v33 }
  0xf5   :  { %v317_v35 = vpop.f32.mrb[0].mxu0  ;;  %v421_v36 = vpop.f32.mrb[0].mxu1 }
  0xf6   :  { %v318_v37 = vadd.f32 %v1041_v34, %v317_v35  ;;  %v702_v38 = vpop.f32.mrb[1].mxu0  ;;  %v422_v39 = vadd.f32 %v1041_v34, %v421_v36  ;;  %v754_v40 = vpop.f32.mrb[1].mxu1 }
  0xf7   :  { %v320_v41 = vpop.f32.mrb[2].mxu0  ;;  %v424_v42 = vpop.f32.mrb[2].mxu1 }
  0xf8   :  { %v515_v43 = vmax.f32 %v318_v37, 0.0  ;;  %v321_v44 = vadd.f32 %v1041_v34, %v320_v41  ;;  %v703_v45 = vpop.f32.mrb[3].mxu0  ;;  %v541_v46 = vmax.f32 %v422_v39, 0.0  ;;  %v425_v47 = vadd.f32 %v1041_v34, %v424_v42  ;;  %v755_v48 = vpop.f32.mrb[3].mxu1 }
  0xfa   :  { %564 = vst [vmem:[%s1242_s3] sm:$0xff] %v515_v43  ;;  %v516_v49 = vmax.f32 %v321_v44, 0.0  ;;  %590 = vst [vmem:[%s1242_s3 + $0xd0] sm:$0xff] %v541_v46  ;;  %v542_v50 = vmax.f32 %v425_v47, 0.0 }
  0xfc   :  { %565 = vst [vmem:[%s1242_s3 + $0x8] sm:$0xff] %v516_v49  ;;  %591 = vst [vmem:[%s1242_s3 + $0xd8] sm:$0xff] %v542_v50 }
  0xfd   :  { %v325_v51 = vpop.f32.mrb[4].mxu0  ;;  %v429_v52 = vpop.f32.mrb[4].mxu1 }
  0xfe   :  { %v326_v53 = vadd.f32 %v1041_v34, %v325_v51  ;;  %v706_v54 = vpop.f32.mrb[5].mxu0  ;;  %v430_v55 = vadd.f32 %v1041_v34, %v429_v52  ;;  %v758_v56 = vpop.f32.mrb[5].mxu1 }
  0xff   :  { %v328_v57 = vpop.f32.mrb[6].mxu0  ;;  %v432_v58 = vpop.f32.mrb[6].mxu1 }
 0x100   :  { %v517_v59 = vmax.f32 %v326_v53, 0.0  ;;  %v329_v60 = vadd.f32 %v1041_v34, %v328_v57  ;;  %v707_v61 = vpop.f32.mrb[7].mxu0  ;;  %v543_v62 = vmax.f32 %v430_v55, 0.0  ;;  %v433_v63 = vadd.f32 %v1041_v34, %v432_v58  ;;  %v759_v0 = vpop.f32.mrb[7].mxu1 }
 0x102   :  { %566 = vst [vmem:[%s1242_s3 + $0x10] sm:$0xff] %v517_v59  ;;  %v518_v1 = vmax.f32 %v329_v60, 0.0  ;;  %592 = vst [vmem:[%s1242_s3 + $0xe0] sm:$0xff] %v543_v62  ;;  %v544_v2 = vmax.f32 %v433_v63, 0.0 }
 0x104   :  { %567 = vst [vmem:[%s1242_s3 + $0x18] sm:$0xff] %v518_v1  ;;  %593 = vst [vmem:[%s1242_s3 + $0xe8] sm:$0xff] %v544_v2 }
 0x105   :  { %v333_v3 = vpop.f32.mrb[8].mxu0  ;;  %v437_v4 = vpop.f32.mrb[8].mxu1 }
 0x106   :  { %v334_v5 = vadd.f32 %v1041_v34, %v333_v3  ;;  %v710_v6 = vpop.f32.mrb[9].mxu0  ;;  %v438_v7 = vadd.f32 %v1041_v34, %v437_v4  ;;  %v762_v8 = vpop.f32.mrb[9].mxu1 }
 0x107   :  { %v336_v9 = vpop.f32.mrb[10].mxu0  ;;  %v440_v10 = vpop.f32.mrb[10].mxu1 }
 0x108   :  { %v519_v11 = vmax.f32 %v334_v5, 0.0  ;;  %v337_v12 = vadd.f32 %v1041_v34, %v336_v9  ;;  %v711_v13 = vpop.f32.mrb[11].mxu0  ;;  %v545_v14 = vmax.f32 %v438_v7, 0.0  ;;  %v441_v15 = vadd.f32 %v1041_v34, %v440_v10  ;;  %v763_v16 = vpop.f32.mrb[11].mxu1 }
 0x10a   :  { %568 = vst [vmem:[%s1242_s3 + $0x20] sm:$0xff] %v519_v11  ;;  %v520_v17 = vmax.f32 %v337_v12, 0.0  ;;  %594 = vst [vmem:[%s1242_s3 + $0xf0] sm:$0xff] %v545_v14  ;;  %v546_v18 = vmax.f32 %v441_v15, 0.0 }
 0x10c   :  { %569 = vst [vmem:[%s1242_s3 + $0x28] sm:$0xff] %v520_v17  ;;  %595 = vst [vmem:[%s1242_s3 + $0xf8] sm:$0xff] %v546_v18 }
 0x10d   :  { %v341_v19 = vpop.f32.mrb[12].mxu0  ;;  %v445_v20 = vpop.f32.mrb[12].mxu1 }
 0x10e   :  { %v342_v21 = vadd.f32 %v1041_v34, %v341_v19  ;;  %v714_v22 = vpop.f32.mrb[13].mxu0  ;;  %v446_v23 = vadd.f32 %v1041_v34, %v445_v20  ;;  %v766_v24 = vpop.f32.mrb[13].mxu1 }
 0x10f   :  { %v344_v25 = vpop.f32.mrb[14].mxu0  ;;  %v448_v26 = vpop.f32.mrb[14].mxu1 }
 0x110   :  { %v521_v27 = vmax.f32 %v342_v21, 0.0  ;;  %v345_v28 = vadd.f32 %v1041_v34, %v344_v25  ;;  %v715_v29 = vpop.f32.mrb[15].mxu0  ;;  %v547_v30 = vmax.f32 %v446_v23, 0.0  ;;  %v449_v31 = vadd.f32 %v1041_v34, %v448_v26  ;;  %v767_v32 = vpop.f32.mrb[15].mxu1 }
 0x112   :  { %570 = vst [vmem:[%s1242_s3 + $0x30] sm:$0xff] %v521_v27  ;;  %v522_v33 = vmax.f32 %v345_v28, 0.0  ;;  %596 = vst [vmem:[%s1242_s3 + $0x100] sm:$0xff] %v547_v30  ;;  %v548_v35 = vmax.f32 %v449_v31, 0.0 }
 0x114   :  { %571 = vst [vmem:[%s1242_s3 + $0x38] sm:$0xff] %v522_v33  ;;  %597 = vst [vmem:[%s1242_s3 + $0x108] sm:$0xff] %v548_v35 }
 0x115   :  { %v349_v36 = vpop.f32.mrb[16].mxu0  ;;  %v453_v37 = vpop.f32.mrb[16].mxu1 }
 0x116   :  { %v350_v38 = vadd.f32 %v1041_v34, %v349_v36  ;;  %v718_v39 = vpop.f32.mrb[17].mxu0  ;;  %v454_v40 = vadd.f32 %v1041_v34, %v453_v37  ;;  %v770_v41 = vpop.f32.mrb[17].mxu1 }
 0x117   :  { %v352_v42 = vpop.f32.mrb[18].mxu0  ;;  %v456_v43 = vpop.f32.mrb[18].mxu1 }
 0x118   :  { %v523_v44 = vmax.f32 %v350_v38, 0.0  ;;  %v353_v45 = vadd.f32 %v1041_v34, %v352_v42  ;;  %v719_v46 = vpop.f32.mrb[19].mxu0  ;;  %v549_v47 = vmax.f32 %v454_v40, 0.0  ;;  %v457_v48 = vadd.f32 %v1041_v34, %v456_v43  ;;  %v771_v49 = vpop.f32.mrb[19].mxu1 }
 0x11a   :  { %572 = vst [vmem:[%s1242_s3 + $0x40] sm:$0xff] %v523_v44  ;;  %v524_v50 = vmax.f32 %v353_v45, 0.0  ;;  %598 = vst [vmem:[%s1242_s3 + $0x110] sm:$0xff] %v549_v47  ;;  %v550_v51 = vmax.f32 %v457_v48, 0.0 }
 0x11c   :  { %573 = vst [vmem:[%s1242_s3 + $0x48] sm:$0xff] %v524_v50  ;;  %599 = vst [vmem:[%s1242_s3 + $0x118] sm:$0xff] %v550_v51 }
 0x11d   :  { %v357_v52 = vpop.f32.mrb[20].mxu0  ;;  %v461_v53 = vpop.f32.mrb[20].mxu1 }
 0x11e   :  { %v358_v54 = vadd.f32 %v1041_v34, %v357_v52  ;;  %v722_v55 = vpop.f32.mrb[21].mxu0  ;;  %v462_v56 = vadd.f32 %v1041_v34, %v461_v53  ;;  %v774_v57 = vpop.f32.mrb[21].mxu1 }
 0x11f   :  { %v360_v58 = vpop.f32.mrb[22].mxu0  ;;  %v464_v59 = vpop.f32.mrb[22].mxu1 }
 0x120   :  { %v525_v60 = vmax.f32 %v358_v54, 0.0  ;;  %v361_v61 = vadd.f32 %v1041_v34, %v360_v58  ;;  %v723_v62 = vpop.f32.mrb[23].mxu0  ;;  %v551_v63 = vmax.f32 %v462_v56, 0.0  ;;  %v465_v0 = vadd.f32 %v1041_v34, %v464_v59  ;;  %v775_v1 = vpop.f32.mrb[23].mxu1 }
 0x122   :  { %574 = vst [vmem:[%s1242_s3 + $0x50] sm:$0xff] %v525_v60  ;;  %v526_v2 = vmax.f32 %v361_v61, 0.0  ;;  %600 = vst [vmem:[%s1242_s3 + $0x120] sm:$0xff] %v551_v63  ;;  %v552_v3 = vmax.f32 %v465_v0, 0.0 }
 0x124   :  { %575 = vst [vmem:[%s1242_s3 + $0x58] sm:$0xff] %v526_v2  ;;  %601 = vst [vmem:[%s1242_s3 + $0x128] sm:$0xff] %v552_v3 }
 0x125   :  { %v365_v4 = vpop.f32.mrb[24].mxu0  ;;  %v469_v5 = vpop.f32.mrb[24].mxu1 }
 0x126   :  { %v366_v6 = vadd.f32 %v1041_v34, %v365_v4  ;;  %v726_v7 = vpop.f32.mrb[25].mxu0  ;;  %v470_v8 = vadd.f32 %v1041_v34, %v469_v5  ;;  %v778_v9 = vpop.f32.mrb[25].mxu1 }
 0x127   :  { %v368_v10 = vpop.f32.mrb[26].mxu0  ;;  %v472_v11 = vpop.f32.mrb[26].mxu1 }
 0x128   :  { %v527_v12 = vmax.f32 %v366_v6, 0.0  ;;  %v369_v13 = vadd.f32 %v1041_v34, %v368_v10  ;;  %v727_v14 = vpop.f32.mrb[27].mxu0  ;;  %v553_v15 = vmax.f32 %v470_v8, 0.0  ;;  %v473_v16 = vadd.f32 %v1041_v34, %v472_v11  ;;  %v779_v17 = vpop.f32.mrb[27].mxu1 }
 0x12a   :  { %576 = vst [vmem:[%s1242_s3 + $0x60] sm:$0xff] %v527_v12  ;;  %v528_v18 = vmax.f32 %v369_v13, 0.0  ;;  %602 = vst [vmem:[%s1242_s3 + $0x130] sm:$0xff] %v553_v15  ;;  %v554_v19 = vmax.f32 %v473_v16, 0.0 }
 0x12c   :  { %577 = vst [vmem:[%s1242_s3 + $0x68] sm:$0xff] %v528_v18  ;;  %603 = vst [vmem:[%s1242_s3 + $0x138] sm:$0xff] %v554_v19 }
 0x12d   :  { %v373_v20 = vpop.f32.mrb[28].mxu0  ;;  %v477_v21 = vpop.f32.mrb[28].mxu1 }
 0x12e   :  { %v374_v22 = vadd.f32 %v1041_v34, %v373_v20  ;;  %v730_v23 = vpop.f32.mrb[29].mxu0  ;;  %v478_v24 = vadd.f32 %v1041_v34, %v477_v21  ;;  %v782_v25 = vpop.f32.mrb[29].mxu1 }
 0x12f   :  { %v376_v26 = vpop.f32.mrb[30].mxu0  ;;  %v480_v27 = vpop.f32.mrb[30].mxu1 }
 0x130   :  { %v529_v28 = vmax.f32 %v374_v22, 0.0  ;;  %v377_v29 = vadd.f32 %v1041_v34, %v376_v26  ;;  %v731_v30 = vpop.f32.mrb[31].mxu0  ;;  %v555_v31 = vmax.f32 %v478_v24, 0.0  ;;  %v481_v32 = vadd.f32 %v1041_v34, %v480_v27  ;;  %v783_v33 = vpop.f32.mrb[31].mxu1 }
 0x132   :  { %578 = vst [vmem:[%s1242_s3 + $0x70] sm:$0xff] %v529_v28  ;;  %v530_v35 = vmax.f32 %v377_v29, 0.0  ;;  %604 = vst [vmem:[%s1242_s3 + $0x140] sm:$0xff] %v555_v31  ;;  %v556_v36 = vmax.f32 %v481_v32, 0.0 }
 0x134   :  { %579 = vst [vmem:[%s1242_s3 + $0x78] sm:$0xff] %v530_v35  ;;  %605 = vst [vmem:[%s1242_s3 + $0x148] sm:$0xff] %v556_v36 }
 0x135   :  { %v381_v37 = vpop.f32.mrb[32].mxu0  ;;  %v485_v38 = vpop.f32.mrb[32].mxu1 }
 0x136   :  { %v382_v39 = vadd.f32 %v1041_v34, %v381_v37  ;;  %v734_v40 = vpop.f32.mrb[33].mxu0  ;;  %v486_v41 = vadd.f32 %v1041_v34, %v485_v38  ;;  %v786_v42 = vpop.f32.mrb[33].mxu1 }
 0x137   :  { %v384_v43 = vpop.f32.mrb[34].mxu0  ;;  %v488_v44 = vpop.f32.mrb[34].mxu1 }
 0x138   :  { %v531_v45 = vmax.f32 %v382_v39, 0.0  ;;  %v385_v46 = vadd.f32 %v1041_v34, %v384_v43  ;;  %v735_v47 = vpop.f32.mrb[35].mxu0  ;;  %v557_v48 = vmax.f32 %v486_v41, 0.0  ;;  %v489_v49 = vadd.f32 %v1041_v34, %v488_v44  ;;  %v787_v50 = vpop.f32.mrb[35].mxu1 }
 0x13a   :  { %580 = vst [vmem:[%s1242_s3 + $0x80] sm:$0xff] %v531_v45  ;;  %v532_v51 = vmax.f32 %v385_v46, 0.0  ;;  %606 = vst [vmem:[%s1242_s3 + $0x150] sm:$0xff] %v557_v48  ;;  %v558_v52 = vmax.f32 %v489_v49, 0.0 }
 0x13c   :  { %581 = vst [vmem:[%s1242_s3 + $0x88] sm:$0xff] %v532_v51  ;;  %607 = vst [vmem:[%s1242_s3 + $0x158] sm:$0xff] %v558_v52 }
 0x13d   :  { %v389_v53 = vpop.f32.mrb[36].mxu0  ;;  %v493_v54 = vpop.f32.mrb[36].mxu1 }
 0x13e   :  { %v390_v55 = vadd.f32 %v1041_v34, %v389_v53  ;;  %v738_v56 = vpop.f32.mrb[37].mxu0  ;;  %v494_v57 = vadd.f32 %v1041_v34, %v493_v54  ;;  %v790_v58 = vpop.f32.mrb[37].mxu1 }
 0x13f   :  { %v392_v59 = vpop.f32.mrb[38].mxu0  ;;  %v496_v60 = vpop.f32.mrb[38].mxu1 }
 0x140   :  { %v533_v61 = vmax.f32 %v390_v55, 0.0  ;;  %v393_v62 = vadd.f32 %v1041_v34, %v392_v59  ;;  %v739_v63 = vpop.f32.mrb[39].mxu0  ;;  %v559_v0 = vmax.f32 %v494_v57, 0.0  ;;  %v497_v1 = vadd.f32 %v1041_v34, %v496_v60  ;;  %v791_v2 = vpop.f32.mrb[39].mxu1 }
 0x142   :  { %582 = vst [vmem:[%s1242_s3 + $0x90] sm:$0xff] %v533_v61  ;;  %v534_v3 = vmax.f32 %v393_v62, 0.0  ;;  %608 = vst [vmem:[%s1242_s3 + $0x160] sm:$0xff] %v559_v0  ;;  %v560_v4 = vmax.f32 %v497_v1, 0.0 }
 0x144   :  { %583 = vst [vmem:[%s1242_s3 + $0x98] sm:$0xff] %v534_v3  ;;  %609 = vst [vmem:[%s1242_s3 + $0x168] sm:$0xff] %v560_v4 }
 0x145   :  { %v397_v5 = vpop.f32.mrb[40].mxu0  ;;  %v501_v6 = vpop.f32.mrb[40].mxu1 }
 0x146   :  { %v398_v7 = vadd.f32 %v1041_v34, %v397_v5  ;;  %v742_v8 = vpop.f32.mrb[41].mxu0  ;;  %v502_v9 = vadd.f32 %v1041_v34, %v501_v6  ;;  %v794_v10 = vpop.f32.mrb[41].mxu1 }
 0x147   :  { %v400_v11 = vpop.f32.mrb[42].mxu0  ;;  %v504_v12 = vpop.f32.mrb[42].mxu1 }
 0x148   :  { %v535_v13 = vmax.f32 %v398_v7, 0.0  ;;  %v401_v14 = vadd.f32 %v1041_v34, %v400_v11  ;;  %v743_v15 = vpop.f32.mrb[43].mxu0  ;;  %v561_v16 = vmax.f32 %v502_v9, 0.0  ;;  %v505_v17 = vadd.f32 %v1041_v34, %v504_v12  ;;  %v795_v18 = vpop.f32.mrb[43].mxu1 }
 0x14a   :  { %584 = vst [vmem:[%s1242_s3 + $0xa0] sm:$0xff] %v535_v13  ;;  %v536_v19 = vmax.f32 %v401_v14, 0.0  ;;  %610 = vst [vmem:[%s1242_s3 + $0x170] sm:$0xff] %v561_v16  ;;  %v562_v20 = vmax.f32 %v505_v17, 0.0 }
 0x14c   :  { %585 = vst [vmem:[%s1242_s3 + $0xa8] sm:$0xff] %v536_v19  ;;  %611 = vst [vmem:[%s1242_s3 + $0x178] sm:$0xff] %v562_v20 }
 0x14d   :  { %v405_v21 = vpop.f32.mrb[44].mxu0  ;;  %v509_v22 = vpop.f32.mrb[44].mxu1 }
 0x14e   :  { %v406_v23 = vadd.f32 %v1041_v34, %v405_v21  ;;  %v746_v24 = vpop.f32.mrb[45].mxu0  ;;  %v510_v25 = vadd.f32 %v1041_v34, %v509_v22  ;;  %v798_v26 = vpop.f32.mrb[45].mxu1 }
 0x14f   :  { %v408_v27 = vpop.f32.mrb[46].mxu0  ;;  %v512_v28 = vpop.f32.mrb[46].mxu1 }
 0x150   :  { %v537_v29 = vmax.f32 %v406_v23, 0.0  ;;  %v409_v30 = vadd.f32 %v1041_v34, %v408_v27  ;;  %v747_v31 = vpop.f32.mrb[47].mxu0  ;;  %v563_v32 = vmax.f32 %v510_v25, 0.0  ;;  %v799_v33 = vpop.f32.mrb[47].mxu1 }
 0x152   :  { %586 = vst [vmem:[%s1242_s3 + $0xb0] sm:$0xff] %v537_v29  ;;  %v538_v35 = vmax.f32 %v409_v30, 0.0  ;;  %612 = vst [vmem:[%s1242_s3 + $0x180] sm:$0xff] %v563_v32 }
 0x154   :  { %587 = vst [vmem:[%s1242_s3 + $0xb8] sm:$0xff] %v538_v35 }
 0x155   :  { %v413_v36 = vpop.f32.mrb[48].mxu0 }
 0x156   :  { %v414_v37 = vadd.f32 %v1041_v34, %v413_v36  ;;  %v750_v38 = vpop.f32.mrb[49].mxu0 }
 0x157   :  { %v416_v39 = vpop.f32.mrb[50].mxu0 }
 0x158   :  { %v539_v40 = vmax.f32 %v414_v37, 0.0  ;;  %v417_v41 = vadd.f32 %v1041_v34, %v416_v39  ;;  %v751_v42 = vpop.f32.mrb[51].mxu0 }
 0x15a   :  { %588 = vst [vmem:[%s1242_s3 + $0xc0] sm:$0xff] %v539_v40  ;;  %v540_v43 = vmax.f32 %v417_v41, 0.0 }
 0x15c   :  { %589 = vst [vmem:[%s1242_s3 + $0xc8] sm:$0xff] %v540_v43 }

</bundles_post_ra>
